<compile_context>
chip_gen: v6e
topology: v6e:2x2x1
jax: 0.10.0
libtpu: 0.0.40
codegen_flags: <defaults>
</compile_context>

<pallas_src>
import jax
import jax.numpy as jnp
from jax.experimental import pallas as pl
from jax.experimental.pallas import tpu as pltpu


def _round_up(x, m):
    return ((x + m - 1) // m) * m


def _choose_tile(dim, target, align):
    """Largest multiple of `align` that divides `dim` and is <= target.

    Falls back to the full extent (always a legal block shape) when no such
    divisor exists or the dim is already small.
    """
    if dim <= align:
        return dim
    target = min(target, dim)
    best = None
    t = align
    while t <= target:
        if dim % t == 0:
            best = t
        t += align
    return best if best is not None else dim


def _disc_kernel(h_ref, w1_ref, b1_ref, w2_ref, b2_ref,
                 out_ref, hid_ref, acc_h, acc_o):
    j = pl.program_id(1)
    k = pl.program_id(2)
    nj = pl.num_programs(1)
    nk = pl.num_programs(2)

    @pl.when(jnp.logical_and(j == 0, k == 0))
    def _():
        acc_o[...] = jnp.zeros_like(acc_o)

    @pl.when(k == 0)
    def _():
        acc_h[...] = jnp.zeros_like(acc_h)

    # fc1 partial product on the MXU (bf16 operands, f32 accumulation).
    acc_h[...] += jnp.dot(h_ref[...], w1_ref[...],
                          preferred_element_type=jnp.float32)

    @pl.when(k == nk - 1)
    def _():
        pre = acc_h[...] + b1_ref[...]
        hidden = jnp.maximum(pre, 0.2 * pre)              # LeakyReLU(0.2): mul+max
        hid_ref[...] = hidden.astype(hid_ref.dtype)
        # fc2 partial: VPU multiply, then fold tn lanes into a 128-wide per-lane
        # accumulator with pure VALU adds (no cross-lane XLU work here).
        prod = hidden * w2_ref[...]                       # (tm, tn) f32
        tn = prod.shape[-1]
        part = acc_o[...]
        for c in range(tn // 128):                        # static trip count
            part = part + prod[:, c * 128:(c + 1) * 128]
        acc_o[...] = part

    @pl.when(jnp.logical_and(j == nj - 1, k == nk - 1))
    def _():
        # Single cross-lane reduce + scalar bias, once per i block.
        out_ref[...] = (jnp.sum(acc_o[...], axis=-1, keepdims=True)
                        + b2_ref[0]).astype(out_ref.dtype)


def discriminator_d1(x, att, prep, *, tm=512, tn=512, tk=512,
                     act_dtype=jnp.bfloat16, hidden_dtype=jnp.bfloat16):
    """Returns (out, hidden) matching Discriminator_D1.forward / .hidden."""
    B, res_size = x.shape
    _, att_size = att.shape
    K, K_pad = prep["K"], prep["K_pad"]
    ndh, ndh_pad = prep["ndh"], prep["ndh_pad"]
    assert res_size + att_size == K

    # Activations are tiny compared to the fc1 weight: concat + cast + pad here
    # so the kernel does clean row-major matmuls over padded 128-multiples.
    # TODO(synk): for large B, fold concat/pad/cast into the kernel via two
    # inputs with k-split index maps to avoid the extra B*K HBM round trip.
    h_in = jnp.concatenate([x.astype(act_dtype), att.astype(act_dtype)], axis=1)
    if K_pad != K:
        h_in = jnp.pad(h_in, ((0, 0), (0, K_pad - K)))

    # Tile selection: sublane align 16 for bf16 activations; keep >=2 i blocks
    # when B permits so the "parallel" batch axis feeds both TCs on v7x.
    m_align = 16 if jnp.dtype(act_dtype).itemsize == 2 else 8
    tm_target = tm
    if B >= 2 * m_align:
        tm_target = min(tm_target, (B // 2 // m_align) * m_align)
    tm = _choose_tile(B, tm_target, m_align)
    tn = _choose_tile(ndh_pad, tn, 128)
    tk = _choose_tile(K_pad, tk, 128)
    assert tn % 128 == 0 and tk % 128 == 0
    grid = (B // tm if B % tm == 0 else 1, ndh_pad // tn, K_pad // tk)

    wbytes = jnp.dtype(prep["w1t"].dtype).itemsize
    abytes = jnp.dtype(act_dtype).itemsize
    hbytes = jnp.dtype(hidden_dtype).itemsize
    ni, nj, _ = grid
    cost = pl.CostEstimate(
        flops=2 * B * K_pad * ndh_pad + 2 * B * ndh_pad,
        transcendentals=0,
        bytes_accessed=(B * K_pad * abytes * nj            # h re-read per j block
                        + K_pad * ndh_pad * wbytes * ni    # w1 re-read per i block
                        + 2 * ndh_pad * 4 * ni + 4
                        + B * ndh_pad * hbytes + B * 4),
    )

    # Double-buffered in/out tiles + scratch, with slack; clamp to sane bounds.
    vmem_est = (2 * (tm * tk * abytes + tk * tn * wbytes + 2 * tn * 4
                     + tm * tn * hbytes + tm * 4)
                + tm * tn * 4 + tm * 128 * 4)
    vmem_limit = min(max(32 * 1024 * 1024, int(1.5 * vmem_est)),
                     128 * 1024 * 1024)

    out, hidden_p = pl.pallas_call(
        _disc_kernel,
        out_shape=(
            jax.ShapeDtypeStruct((B, 1), jnp.float32),
            jax.ShapeDtypeStruct((B, ndh_pad), hidden_dtype),
        ),
        grid=grid,
        in_specs=[
            pl.BlockSpec((tm, tk), lambda i, j, k: (i, k)),      # concat(x, att) tile
            pl.BlockSpec((tk, tn), lambda i, j, k: (k, j)),      # fc1 weight tile
            pl.BlockSpec((1, tn), lambda i, j, k: (0, j)),       # fc1 bias row
            pl.BlockSpec((1, tn), lambda i, j, k: (0, j)),       # fc2 weight row
            pl.BlockSpec(memory_space=pltpu.MemorySpace.SMEM),   # fc2 bias scalar
        ],
        out_specs=(
            pl.BlockSpec((tm, 1), lambda i, j, k: (i, 0)),       # logit
            pl.BlockSpec((tm, tn), lambda i, j, k: (i, j)),      # hidden (bf16)
        ),
        scratch_shapes=[
            pltpu.VMEM((tm, tn), jnp.float32),     # fc1 accumulator
            pltpu.VMEM((tm, 128), jnp.float32),    # fc2 per-lane accumulator
        ],
        compiler_params=pltpu.CompilerParams(
            dimension_semantics=("parallel", "arbitrary", "arbitrary"),
            vmem_limit_bytes=vmem_limit,
        ),
        cost_estimate=cost,
    )(h_in, prep["w1t"], prep["b1"], prep["w2row"], prep["b2"])

    hidden = hidden_p[:, :ndh] if ndh_pad != ndh else hidden_p
    return out, hidden


def init_params(key, res_size, att_size, ndh):
    """Deterministic init mirroring weights_init: weight ~ N(0, 0.02), bias = 0."""
    k1, k2 = jax.random.split(key)
    w1 = 0.02 * jax.random.normal(k1, (ndh, res_size + att_size), dtype=jnp.float32)
    b1 = jnp.zeros((ndh,), dtype=jnp.float32)
    w2 = 0.02 * jax.random.normal(k2, (1, ndh), dtype=jnp.float32)
    b2 = jnp.zeros((1,), dtype=jnp.float32)
    return {"w1": w1, "b1": b1, "w2": w2, "b2": b2}


def prepare_params(params, weight_dtype=jnp.bfloat16, lane=128):
    """One-time param prep (NOT per-call): (out,in)->(in,out) layout, bf16 cast,
    and zero-padding of K / ndh up to 128-multiples (keeps all tiles legal and
    the reduction grid axis intact)."""
    w1, b1, w2, b2 = params["w1"], params["b1"], params["w2"], params["b2"]
    ndh, K = w1.shape
    K_pad = _round_up(K, lane)
    ndh_pad = _round_up(ndh, lane)
    w1t = jnp.pad(jnp.transpose(w1), ((0, K_pad - K), (0, ndh_pad - ndh)))
    b1p = jnp.pad(b1, (0, ndh_pad - ndh)).reshape(1, ndh_pad)
    w2p = jnp.pad(w2.reshape(-1), (0, ndh_pad - ndh)).reshape(1, ndh_pad)
    return {
        "w1t": w1t.astype(weight_dtype),            # (K_pad, ndh_pad) bf16
        "b1": b1p.astype(jnp.float32),              # (1, ndh_pad)
        "w2row": w2p.astype(jnp.float32),           # (1, ndh_pad)
        "b2": b2.reshape(1).astype(jnp.float32),    # (1,) scalar -> SMEM
        "K": K, "K_pad": K_pad, "ndh": ndh, "ndh_pad": ndh_pad,
    }


if __name__ == "__main__":
    # Small shapes consistent with the module (opt.resSize, opt.attSize, opt.ndh).
    # Deliberately non-128-multiples to exercise the padding path; demo tiles
    # chosen so every grid axis has >= 2 blocks (grid = (2, 2, 2)).
    B, RES, ATT, NDH = 32, 300, 100, 200     # K = 400 -> 512 padded; ndh -> 256

    key = jax.random.PRNGKey(0)
    kx, ka, kp = jax.random.split(key, 3)
    x = jax.random.normal(kx, (B, RES), dtype=jnp.float32)
    att = jax.random.normal(ka, (B, ATT), dtype=jnp.float32)
    params = init_params(kp, RES, ATT, NDH)
    prep = prepare_params(params)            # hoisted one-time weight prep

    out, hidden = discriminator_d1(x, att, prep, tm=16, tn=128, tk=256)
    out = jax.block_until_ready(out)
    hidden = jax.block_until_ready(hidden)
    assert out.shape == (B, 1) and hidden.shape == (B, NDH)

    # Reference 1: numerics matched to the kernel (bf16 operands, f32 accumulation).
    h_bf16 = jnp.concatenate([x.astype(jnp.bfloat16), att.astype(jnp.bfloat16)], axis=1)
    w1t_bf16 = jnp.transpose(params["w1"]).astype(jnp.bfloat16)
    pre = jnp.dot(h_bf16, w1t_bf16, preferred_element_type=jnp.float32) + params["b1"]
    hid_m = jnp.maximum(pre, 0.2 * pre)
    out_m = jnp.sum(hid_m * params["w2"], axis=-1, keepdims=True) + params["b2"]
    hid_f32 = hidden.astype(jnp.float32)
    assert jnp.allclose(hid_f32, hid_m, atol=2e-2, rtol=2e-2), "hidden mismatch (matched ref)"
    assert jnp.allclose(out, out_m, atol=2e-2, rtol=2e-2), "output mismatch (matched ref)"

    # Reference 2: full-f32 PyTorch semantics (loose tolerance for bf16 weights/acts).
    h_cat = jnp.concatenate([x, att], axis=1)
    pre32 = h_cat @ params["w1"].T + params["b1"]
    hid32 = jnp.maximum(pre32, 0.2 * pre32)
    out32 = hid32 @ params["w2"].T + params["b2"]
    assert jnp.allclose(hid_f32, hid32, atol=5e-2, rtol=5e-2), "hidden mismatch (f32 ref)"
    assert jnp.allclose(out, out32, atol=5e-2, rtol=5e-2), "output mismatch (f32 ref)"

    print("KERNEL_OK")
</pallas_src>

<mosaic_0001>
module attributes {stable_mosaic.version = 11 : i64} {
  func.func @_disc_kernel(%arg0: i32, %arg1: i32, %arg2: i32, %arg3: memref<16x256xbf16, #tpu.memory_space<vmem>>, %arg4: memref<256x128xbf16, #tpu.memory_space<vmem>>, %arg5: memref<1x128xf32, #tpu.memory_space<vmem>>, %arg6: memref<1x128xf32, #tpu.memory_space<vmem>>, %arg7: memref<1xf32, #tpu.memory_space<smem>>, %arg8: memref<16x1xf32, #tpu.memory_space<vmem>>, %arg9: memref<16x128xbf16, #tpu.memory_space<vmem>>, %arg10: memref<16x128xf32, #tpu.memory_space<vmem>>, %arg11: memref<16x128xf32, #tpu.memory_space<vmem>>) attributes {dimension_semantics = [#tpu.dimension_semantics<parallel>, #tpu.dimension_semantics<arbitrary>, #tpu.dimension_semantics<arbitrary>], iteration_bounds = array<i64: 2, 2, 2>, scalar_prefetch = 0 : i64, scratch_operands = 2 : i64, tpu.core_type = #tpu.core_type<tc>, window_params = [{transform_indices = @transform_0, window_bounds = array<i64: 16, 256>}, {transform_indices = @transform_1, window_bounds = array<i64: 256, 128>}, {transform_indices = @transform_2, window_bounds = array<i64: 1, 128>}, {transform_indices = @transform_3, window_bounds = array<i64: 1, 128>}, {transform_indices = @transform_4, window_bounds = array<i64: 1>}, {transform_indices = @transform_5, window_bounds = array<i64: 16, 1>}, {transform_indices = @transform_6, window_bounds = array<i64: 16, 128>}]} {
    %c0_i32 = arith.constant 0 : i32
    %0 = arith.cmpi eq, %arg1, %c0_i32 : i32
    %c0_i32_0 = arith.constant 0 : i32
    %1 = arith.cmpi eq, %arg2, %c0_i32_0 : i32
    %2 = arith.andi %0, %1 : i1
    %3 = arith.extui %2 : i1 to i32
    %c0_i32_1 = arith.constant 0 : i32
    %4 = arith.cmpi ne, %3, %c0_i32_1 : i32
    scf.if %4 {
      %cst_15 = arith.constant 0.000000e+00 : f32
      %22 = vector.broadcast %cst_15 : f32 to vector<16x128xf32>
      %c0_16 = arith.constant 0 : index
      %c0_17 = arith.constant 0 : index
      %23 = vector.load %arg11[%c0_16, %c0_17] : memref<16x128xf32, #tpu.memory_space<vmem>>, vector<16x128xf32>
      tpu.vector_store %arg11[%c0_16, %c0_17], %22 {strides = array<i32>} : memref<16x128xf32, #tpu.memory_space<vmem>>, vector<16x128xf32>,
    } else {
    }
    %c0_i32_2 = arith.constant 0 : i32
    %5 = arith.cmpi eq, %arg2, %c0_i32_2 : i32
    %6 = arith.extui %5 : i1 to i32
    %c0_i32_3 = arith.constant 0 : i32
    %7 = arith.cmpi ne, %6, %c0_i32_3 : i32
    scf.if %7 {
      %cst_15 = arith.constant 0.000000e+00 : f32
      %22 = vector.broadcast %cst_15 : f32 to vector<16x128xf32>
      %c0_16 = arith.constant 0 : index
      %c0_17 = arith.constant 0 : index
      %23 = vector.load %arg10[%c0_16, %c0_17] : memref<16x128xf32, #tpu.memory_space<vmem>>, vector<16x128xf32>
      tpu.vector_store %arg10[%c0_16, %c0_17], %22 {strides = array<i32>} : memref<16x128xf32, #tpu.memory_space<vmem>>, vector<16x128xf32>,
    } else {
    }
    %c0 = arith.constant 0 : index
    %c0_4 = arith.constant 0 : index
    %8 = vector.load %arg10[%c0, %c0_4] : memref<16x128xf32, #tpu.memory_space<vmem>>, vector<16x128xf32>
    %c0_5 = arith.constant 0 : index
    %c0_6 = arith.constant 0 : index
    %9 = vector.load %arg3[%c0_5, %c0_6] : memref<16x256xbf16, #tpu.memory_space<vmem>>, vector<16x256xbf16>
    %c0_7 = arith.constant 0 : index
    %c0_8 = arith.constant 0 : index
    %10 = vector.load %arg4[%c0_7, %c0_8] : memref<256x128xbf16, #tpu.memory_space<vmem>>, vector<256x128xbf16>
    %cst = arith.constant dense<0.000000e+00> : vector<16x128xf32>
    %11 = tpu.matmul %9, %10, %cst {dimension_numbers = #tpu.dot_dimension_numbers<[1], [0], [0], [1], [0, 0, 1, 1], [], []>} : vector<16x256xbf16>, vector<256x128xbf16>, vector<16x128xf32> -> vector<16x128xf32>
    %12 = arith.addf %8, %11 : vector<16x128xf32>
    %c0_9 = arith.constant 0 : index
    %c0_10 = arith.constant 0 : index
    %13 = vector.load %arg10[%c0_9, %c0_10] : memref<16x128xf32, #tpu.memory_space<vmem>>, vector<16x128xf32>
    tpu.vector_store %arg10[%c0_9, %c0_10], %12 {strides = array<i32>} : memref<16x128xf32, #tpu.memory_space<vmem>>, vector<16x128xf32>,
    %c1_i32 = arith.constant 1 : i32
    %14 = arith.cmpi eq, %arg2, %c1_i32 : i32
    %15 = arith.extui %14 : i1 to i32
    %c0_i32_11 = arith.constant 0 : i32
    %16 = arith.cmpi ne, %15, %c0_i32_11 : i32
    scf.if %16 {
      %c0_15 = arith.constant 0 : index
      %c0_16 = arith.constant 0 : index
      %22 = vector.load %arg10[%c0_15, %c0_16] : memref<16x128xf32, #tpu.memory_space<vmem>>, vector<16x128xf32>
      %c0_17 = arith.constant 0 : index
      %c0_18 = arith.constant 0 : index
      %23 = vector.load %arg5[%c0_17, %c0_18] : memref<1x128xf32, #tpu.memory_space<vmem>>, vector<1x128xf32>
      %24 = vector.broadcast %23 : vector<1x128xf32> to vector<16x128xf32>
      %25 = arith.addf %22, %24 : vector<16x128xf32>
      %cst_19 = arith.constant 2.000000e-01 : f32
      %26 = vector.broadcast %cst_19 : f32 to vector<16x128xf32>
      %27 = arith.mulf %26, %25 : vector<16x128xf32>
      %28 = arith.maximumf %25, %27 : vector<16x128xf32>
      %29 = arith.truncf %28 : vector<16x128xf32> to vector<16x128xbf16>
      %c0_20 = arith.constant 0 : index
      %c0_21 = arith.constant 0 : index
      %30 = vector.load %arg9[%c0_20, %c0_21] : memref<16x128xbf16, #tpu.memory_space<vmem>>, vector<16x128xbf16>
      tpu.vector_store %arg9[%c0_20, %c0_21], %29 {strides = array<i32>} : memref<16x128xbf16, #tpu.memory_space<vmem>>, vector<16x128xbf16>,
      %c0_22 = arith.constant 0 : index
      %c0_23 = arith.constant 0 : index
      %31 = vector.load %arg6[%c0_22, %c0_23] : memref<1x128xf32, #tpu.memory_space<vmem>>, vector<1x128xf32>
      %32 = vector.broadcast %31 : vector<1x128xf32> to vector<16x128xf32>
      %33 = arith.mulf %28, %32 : vector<16x128xf32>
      %c0_24 = arith.constant 0 : index
      %c0_25 = arith.constant 0 : index
      %34 = vector.load %arg11[%c0_24, %c0_25] : memref<16x128xf32, #tpu.memory_space<vmem>>, vector<16x128xf32>
      %35 = arith.addf %34, %33 : vector<16x128xf32>
      %c0_26 = arith.constant 0 : index
      %c0_27 = arith.constant 0 : index
      %36 = vector.load %arg11[%c0_26, %c0_27] : memref<16x128xf32, #tpu.memory_space<vmem>>, vector<16x128xf32>
      tpu.vector_store %arg11[%c0_26, %c0_27], %35 {strides = array<i32>} : memref<16x128xf32, #tpu.memory_space<vmem>>, vector<16x128xf32>,
    } else {
    }
    %c1_i32_12 = arith.constant 1 : i32
    %17 = arith.cmpi eq, %arg1, %c1_i32_12 : i32
    %c1_i32_13 = arith.constant 1 : i32
    %18 = arith.cmpi eq, %arg2, %c1_i32_13 : i32
    %19 = arith.andi %17, %18 : i1
    %20 = arith.extui %19 : i1 to i32
    %c0_i32_14 = arith.constant 0 : i32
    %21 = arith.cmpi ne, %20, %c0_i32_14 : i32
    scf.if %21 {
      %c0_15 = arith.constant 0 : index
      %c0_16 = arith.constant 0 : index
      %22 = vector.load %arg11[%c0_15, %c0_16] : memref<16x128xf32, #tpu.memory_space<vmem>>, vector<16x128xf32>
      %cst_17 = arith.constant dense<0.000000e+00> : vector<16xf32>
      %23 = vector.multi_reduction <add>, %22, %cst_17 [1] : vector<16x128xf32> to vector<16xf32>
      %24 = vector.shape_cast %23 : vector<16xf32> to vector<16x1xf32>
      %c0_18 = arith.constant 0 : index
      %25 = memref.load %arg7[%c0_18] : memref<1xf32, #tpu.memory_space<smem>>
      %26 = vector.broadcast %25 : f32 to vector<16x1xf32>
      %27 = arith.addf %24, %26 : vector<16x1xf32>
      %c0_19 = arith.constant 0 : index
      %c0_20 = arith.constant 0 : index
      %28 = vector.load %arg8[%c0_19, %c0_20] : memref<16x1xf32, #tpu.memory_space<vmem>>, vector<16x1xf32>
      tpu.vector_store %arg8[%c0_19, %c0_20], %27 {strides = array<i32>} : memref<16x1xf32, #tpu.memory_space<vmem>>, vector<16x1xf32>,
    } else {
    }
    return
  }
  func.func @transform_0(%arg0: i32, %arg1: i32, %arg2: i32) -> (i32, i32) {
    %c0_i32 = arith.constant 0 : i32
    return %arg0, %arg2 : i32, i32
  }
  func.func @transform_1(%arg0: i32, %arg1: i32, %arg2: i32) -> (i32, i32) {
    %c0_i32 = arith.constant 0 : i32
    return %arg2, %arg1 : i32, i32
  }
  func.func @transform_2(%arg0: i32, %arg1: i32, %arg2: i32) -> (i32, i32) {
    %c0_i32 = arith.constant 0 : i32
    %c0_i32_0 = arith.constant 0 : i32
    return %c0_i32, %arg1 : i32, i32
  }
  func.func @transform_3(%arg0: i32, %arg1: i32, %arg2: i32) -> (i32, i32) {
    %c0_i32 = arith.constant 0 : i32
    %c0_i32_0 = arith.constant 0 : i32
    return %c0_i32, %arg1 : i32, i32
  }
  func.func @transform_4(%arg0: i32, %arg1: i32, %arg2: i32) -> i32 {
    %c0_i32 = arith.constant 0 : i32
    %c0_i32_0 = arith.constant 0 : i32
    return %c0_i32 : i32
  }
  func.func @transform_5(%arg0: i32, %arg1: i32, %arg2: i32) -> (i32, i32) {
    %c0_i32 = arith.constant 0 : i32
    %c0_i32_0 = arith.constant 0 : i32
    return %arg0, %c0_i32 : i32, i32
  }
  func.func @transform_6(%arg0: i32, %arg1: i32, %arg2: i32) -> (i32, i32) {
    %c0_i32 = arith.constant 0 : i32
    return %arg0, %arg1 : i32, i32
  }
}

</mosaic_0001>

<bundles_post_ra>
// kernel: tpu_custom_call.1
= control target key start
LH: loop header
LB: loop body
LE: loop exit
PB: predicated region body
PF: predicated region fallthrough
CT: control target
= control target key end

     0   :  { %s1771_s0 = inlined_call_operand.hbm [shape: bf16[32,512], index: 0, kind: input, shape index: {}]   ;;  %s1772_s1 = inlined_call_operand.hbm [shape: bf16[512,256], index: 1, kind: input, shape index: {}]   ;;  %s1773_s2 = inlined_call_operand.vmem [shape: f32[1,256], index: 2, kind: input, shape index: {}]   ;;  %s1774_s3 = inlined_call_operand.vmem [shape: f32[1,256], index: 3, kind: input, shape index: {}]   ;;  %s1775_s4 = inlined_call_operand.<no memory space> [shape: f32[1], index: 4, kind: input, shape index: {}]   ;;  %s1776_s5 = inlined_call_operand.vmem [shape: f32[32,1], index: 5, kind: output, shape index: {0}]   ;;  %s1777_s6 = inlined_call_operand.hbm [shape: bf16[32,256], index: 6, kind: output, shape index: {1}]  }
   0x1   :  { %1796 = sst [smem:[#allocation27_spill]] %s1771_s0 }
   0x2   :  { %1797 = sst [smem:[#allocation28_spill]] %s1772_s1 }
   0x3   :  { %1798 = sst [smem:[#allocation29_spill]] %s1773_s2 }
   0x4   :  { %1799 = sst [smem:[#allocation30_spill]] %s1774_s3 }
   0x5   :  { %1800 = sst [smem:[#allocation31_spill]] %s1776_s5 }
   0x6   :  { %1801 = sst [smem:[#allocation32_spill]] %s1777_s6 }
   0x7   :  { %12 = sst [smem:[#allocation4]] %s1775_s4 }
   0x8   :  { %13 = vsyncpa [#allocation6], 0 }
   0x9   :  { %15 = vsyncpa [#allocation6 + $0x1], 0 }
   0xa   :  { %16 = vsyncpa [#allocation9], 0 }
   0xb   :  { %18 = vsyncpa [#allocation9 + $0x1], 0 }
   0xc   :  { %19 = vsyncpa [#allocation7], 0 }
   0xd   :  { %21 = vsyncpa [#allocation7 + $0x1], 0  ;;  %s1368_s23 = smov 0   ;;  %s1370_s24 = smov 0  }
   0xe   :  { %s1372_s25 = smov 0   ;;  %s1374_s26 = smov 0  }
   0xf   :  { %s1376_s27 = smov 0   ;;  %s1378_s28 = smov 0  }
  0x10   :  { %s1380_s29 = smov 0   ;;  %s1382_s4 = smov 0  }
  0x11   :  { %s1384_s30 = smov 0   ;;  %s1386_s7 = smov 0  }
  0x12   :  { %s1388_s8 = smov 0   ;;  %s1390_s9 = smov 0  }
  0x13   :  { %s1392_s10 = smov 0   ;;  %s1394_s11 = smov 0  }
  0x14   :  { %s1396_s12 = smov 0   ;;  %s1398_s13 = smov 0  }
  0x15 LB: > { %1802 = sst [smem:[#allocation14_spill]] %s1283_s4  ;;  %s838_s14 = sadd.s32 4294967295, %s1315_s13   ;;  %s1315_s13 = sphi %s1398_s13, %s27_s13   ;;  %s1311_s12 = sphi %s1396_s12, %s1866_s12   ;;  %s1307_s11 = sphi %s1394_s11, %s1865_s11   ;;  %s1303_s10 = sphi %s1392_s10, %s1864_s10   ;;  %s1299_s9 = sphi %s1390_s9, %s1863_s9   ;;  %s1295_s8 = sphi %s1388_s8, %s1862_s8   ;;  %s1291_s7 = sphi %s1386_s7, %s1874_s7   ;;  %s1287_s30 = sphi %s1384_s30, %s1860_s30   ;;  %s1283_s4 = sphi %s1382_s4, %s1859_s4   ;;  %s1279_s29 = sphi %s1380_s29, %s1858_s29   ;;  %s1275_s28 = sphi %s1378_s28, %s1873_s28   ;;  %s1271_s27 = sphi %s1376_s27, %s1872_s27   ;;  %s1267_s26 = sphi %s1374_s26, %s1871_s26   ;;  %s1263_s25 = sphi %s1372_s25, %s1870_s25   ;;  %s1259_s24 = sphi %s1370_s24, %s1869_s24   ;;  %s1255_s23 = sphi %s1368_s23, %s1867_s23  }
  0x16   : > { %1803 = sst [smem:[#allocation15_spill]] %s1287_s30  ;;  %s39_s15 = sadd.s32 1, %s1303_s10 }
  0x17   : > { %1804 = sst [smem:[#allocation16_spill]] %s1291_s7  ;;  %p1448_p0 = scmp.ge.s32.totalorder %s39_s15, 2 }
  0x18   : > { %1805 = sst [smem:[#allocation17_spill]] %s1295_s8  ;;  %p62_p1 = scmp.ne.s32.totalorder %s1287_s30, %s1283_s4 }
  0x19   : > { %1806 = sst [smem:[#allocation18_spill]] %s1299_s9  ;;  %s1876_s15 = smov (%p1448_p0, %s39_s15), 0 }
  0x1a   : > { %1807 = sst [smem:[#allocation19_spill]] %s1303_s10  ;;  %p1786_p2 = scmp.eq.s32.totalorder %s1315_s13, 0 }
  0x1b   : > { %1808 = sst [smem:[#allocation20_spill]] %s1307_s11  ;;  %p68_p3 = scmp.ne.s32.totalorder %s1283_s4, %s1279_s29 }
  0x1c   : > { %1809 = sst [smem:[#allocation21_spill]] %s1311_s12  ;;  %s1464_s19 = ssub.s32 %s1303_s10, %s1876_s15 }
  0x1d   : > { %1811 = sst [smem:[#allocation22_spill]] %s1876_s15  ;;  %p1466_p4 = scmp.eq.s32.totalorder %s838_s14, 0 }
  0x1e   : > { %p1472_p5 = por %p1786_p2, %p62_p1  ;;  %p1476_p6 = scmp.eq.s32.totalorder %s838_s14, 7 }
  0x1f   : > { %p1482_p7 = por %p1466_p4, %p68_p3  ;;  %p1785_p8 = scmp.lt.s32.totalorder %s1315_s13, 8 }
  0x20   : > { %s250_s18 = sand.u32 1, %s1287_s30   ;;  %s844_s15 = sshll.u32 %s1303_s10, 1 }
  0x21   : > { %s1815_s29 = scalar_select %p1482_p7, 1, 0 }
  0x22   : > { %s842_s17 = sshll.u32 %s250_s18, 4  ;;  %s887_s6 = sshll.u32 %s1311_s12, 3 }
  0x23   : > { %1816 = sst [smem:[#allocation23_spill]] %s1815_s29  ;;  %s254_s5 = scalar_lea.vmem [#allocation5], %s842_s17 }
  0x24   : > { %s264_s3 = sshll.u32 %s254_s5, 4  ;;  %s261_s2 = sadd.s32 %s887_s6, %s844_s15  ;;  %s265_s3 = int_to_ptr.vmem [resolvable:$true] %s264_s3 }
  0x25   : > { %s846_s7 = sshll.u32 %s261_s2, 6  ;;  %p1494_p9 = pnand %p1785_p8, %p1472_p5 }
  0x26   : > { %s1818_s0 = sld [smem:[#allocation27_spill]]  ;;  %p851_p10 = scmp.ge.s32.totalorder %s1315_s13, 1 }
  0x27   : > { %s251_s4 = scalar_lea.sflag [#allocation6], %s250_s18  ;;  %p1097_p11 = pneg %p1494_p9 }
  0x28   : > { %s1108_s17 = scalar_lea.vmem %s265_s3, 256  ;;  %s1317_s2 = smov [#allocation5]  }
  0x29   : > { %p1109_p12 = scmp.ne.s32.totalorder %s265_s3, %s1108_s17  ;;  %s1113_s5 = sshll.u32 %s1317_s2, 4  ;;  %s1114_s5 = int_to_ptr.vmem [resolvable:$false] %s1113_s5 }
  0x2a   : > { %s1115_s6 = scalar_lea.vmem %s1114_s5, 512  ;;  %p1116_p3 = scmp.lt.s32.totalorder %s265_s3, %s1114_s5 }
  0x2b   : > { %p1111_p13 = pnand %p1109_p12, %p1097_p11  ;;  %p1117_p5 = scmp.lt.s32.totalorder %s1115_s6, %s1108_s17 }
  0x2c   : > { %s263_s29 = scalar_lea.hbm %s1818_s0, %s846_s7 }
  0x2d   : > { %p1112_p1 = pneg %p1111_p13  ;;  %p1118_p8 = por %p1117_p5, %p1116_p3 }
  0x2f   : > { %p1119_p2 = pnand %p1118_p8, %p1112_p1 }
  0x31   : > { %1122 = shalt.err (!%p1119_p2)
}
  0x32   : > { %s1318_s8 = smov 256   ;;  %s1787_s7 = smov 128  }
  0x33   : > { %s1320_s9 = smov 8   ;;  %p307_p2 = scmp.lt.s32.totalorder %s1315_s13, 9 }
  0x34   : > { %928 = dma.hbm_to_vmem [thread:$0]  (!%p1494_p9), %s263_s29, 256, %s265_s3, %s251_s4, %s1318_s8, %s1787_s7, %s1320_s9  }
  0x35   : > { %p1510_p8 = pnand %p851_p10, %p307_p2  ;;  %s839_s18 = sadd.s32 4294967294, %s1315_s13  }
  0x36   : > { %s42_s21 = sadd.s32 1, %s1307_s11  ;;  %s83_s17 = sadd.s32 1, %s1275_s28 }
  0x37   : > { %s1878_s21 = smov (!%p1448_p0, %s42_s21), %s1307_s11  ;;  %p90_p11 = scmp.ne.s32.totalorder %s1275_s28, %s1271_s27 }
  0x38   : > { %p44_p12 = scmp.ge.s32.totalorder %s1878_s21, 2  ;;  %p96_p9 = scmp.ne.s32.totalorder %s1271_s27, %s1267_s26 }
  0x39   : > { %p1820_p13 = scmp.eq.s32.totalorder %s1315_s13, 0  ;;  %s210_s4 = sadd.s32 1, %s1263_s25 }
  0x3a   : > { %s1880_s21 = smov (%p44_p12, %s1878_s21), 0  ;;  %s1823_s29 = sadd.s32 1, %s1311_s12 }
  0x3b   : > { %p1526_p1 = por %p90_p11, %p1820_p13  ;;  %1822 = sst [smem:[#allocation24_spill]] %s1880_s21 }
  0x3c   : > { %s1882_s29 = smov (!%p44_p12, %s1823_s29), %s1311_s12  ;;  %s79_s16 = ssub.s32 %s1307_s11, %s1880_s21 }
  0x3d   : > { %p1540_p0 = por %p96_p9, %p1466_p4  ;;  %p48_p10 = scmp.ge.s32.totalorder %s1882_s29, 2 }
  0x3e   : > { %s80_s26 = sor.u32 %s79_s16, %s1464_s19  ;;  %p220_p5 = scmp.ne.s32.totalorder %s1263_s25, %s1259_s24 }
  0x3f   : > { %p81_p3 = scmp.eq.s32.totalorder %s80_s26, 0  ;;  %s1884_s29 = smov (%p48_p10, %s1882_s29), 0 }
  0x40   : > { %1825 = sst [smem:[#allocation25_spill]] %s1884_s29  ;;  %s50_s20 = ssub.s32 %s1311_s12, %s1884_s29 }
  0x41   : > { %s1550_s2 = scalar_select %p81_p3, %s1275_s28, %s83_s17  }
  0x42   : > { %p1556_p2 = por %p1476_p6, %p220_p5  ;;  %s52_s6 = sor.u32 %s1464_s19, %s50_s20 }
  0x43   : > { %s207_s8 = sor.u32 %s79_s16, %s50_s20  ;;  %p53_p4 = scmp.eq.s32.totalorder %s52_s6, 0 }
  0x44   : > { %s1826_s5 = scalar_select %p1556_p2, 1, 0 }
  0x45   : > { %p208_p11 = scmp.eq.s32.totalorder %s207_s8, 0  ;;  %p226_p12 = scmp.ne.s32.totalorder %s1259_s24, %s1255_s23 }
  0x46   : > { %p227_p9 = scmp.eq.s32.totalorder %s839_s18, 7  ;;  %s1827_s9 = sadd.s32 1, %s1287_s30 }
  0x47   : > { %s1566_s26 = scalar_select %p53_p4, %s1287_s30, %s1827_s9  }
  0x48   : > { %s1569_s7 = scalar_select %p208_p11, %s1263_s25, %s210_s4  }
  0x49   : > { %1828 = sst [smem:[#allocation26_spill]] %s1566_s26  ;;  %p1571_p13 = por %p227_p9, %p226_p12 }
  0x4a   : > { %s274_s22 = sand.u32 1, %s1275_s28   ;;  %s888_s29 = sshll.u32 %s1303_s10, 6 }
  0x4b   : > { %s1829_s17 = scalar_select %p1571_p13, 1, 0 }
  0x4c   : > { %s847_s0 = sshll.u32 %s274_s22, 7  ;;  %s284_s19 = sadd.s32 %s1307_s11, %s888_s29 }
  0x4d   : > { %s278_s16 = scalar_lea.vmem [#allocation8], %s847_s0  ;;  %s850_s6 = sshll.u32 %s284_s19, 6 }
  0x4e   : > { %s287_s20 = sshll.u32 %s278_s16, 4  ;;  %s1830_s1 = sld [smem:[#allocation28_spill]]  ;;  %s288_s20 = int_to_ptr.vmem [resolvable:$true] %s287_s20 }
  0x4f   : > { %p1831_p6 = scmp.lt.s32.totalorder %s1315_s13, 8  ;;  %s275_s9 = scalar_lea.sflag [#allocation9], %s274_s22 }
  0x50   : > { %s1136_s12 = scalar_lea.vmem %s288_s20, 2048  ;;  %s1321_s0 = smov [#allocation8]  }
  0x51   : > { %p1585_p10 = pnand %p1831_p6, %p1526_p1  ;;  %p1137_p5 = scmp.ne.s32.totalorder %s288_s20, %s1136_s12 }
  0x52   : > { %s1141_s29 = sshll.u32 %s1321_s0, 4  ;;  %s1142_s29 = int_to_ptr.vmem [resolvable:$false] %s1141_s29 }
  0x53   : > { %p1125_p3 = pneg %p1585_p10  ;;  %s1143_s19 = scalar_lea.vmem %s1142_s29, 4096 }
  0x54   : > { %s286_s18 = scalar_lea.hbm %s1830_s1, %s850_s6  ;;  %p1144_p12 = scmp.lt.s32.totalorder %s288_s20, %s1142_s29 }
  0x55   : > { %p1139_p4 = pnand %p1137_p5, %p1125_p3  ;;  %p1145_p9 = scmp.lt.s32.totalorder %s1143_s19, %s1136_s12 }
  0x57   : > { %p1140_p11 = pneg %p1139_p4  ;;  %p1146_p13 = por %p1145_p9, %p1144_p12 }
  0x59   : > { %p1147_p2 = pnand %p1146_p13, %p1140_p11 }
  0x5b   : > { %1150 = shalt.err (!%p1147_p2)
}
  0x5c   : > { %s1322_s21 = smov 64   ;;  %s1323_s3 = smov 4  }
  0x5d   : > { %s1833_s22 = smov 128   ;;  %311 = sbr.rel (%p1510_p8) target bundleno = 588 (0x24c), region = 40 }
  0x5e   : > { %931 = dma.hbm_to_vmem [thread:$0]  (!%p1585_p10), %s286_s18, 2048, %s288_s20, %s275_s9, %s1833_s22, %s1322_s21, %s1323_s3  }
  0x5f   : > { %s1834_s16 = sld [smem:[#allocation14_spill]] (!%p1510_p8) }
  0x65   : > { %s313_s8 = sand.u32 1, %s1834_s16  }
  0x66   : > { %s1597_s0 = sshll.u32 %s313_s8, 4  ;;  %s314_s29 = scalar_lea.sflag [#allocation6], %s313_s8 }
  0x67   : > { %1242 = dma.done.wait (%p1482_p7), %s314_s29, 256  }
  0x68   : > { %1244 = vsyncadd (%p1482_p7), %s314_s29, 4294967040  ;;  %s322_s4 = sand.u32 1, %s1271_s27  }
  0x69   : > { %s853_s20 = sshll.u32 %s322_s4, 7  ;;  %s323_s18 = scalar_lea.sflag [#allocation9], %s322_s4 }
  0x6a   : > { %s1605_s15 = scalar_lea.vmem [#allocation8], %s853_s20 }
  0x6b   : > { %1246 = dma.done.wait (%p1540_p0), %s323_s18, 2048  }
  0x6c   : > { %1248 = vsyncadd (%p1540_p0), %s323_s18, 4294965248  ;;  %s1836_s9 = sld [smem:[#allocation17_spill]]  ;;  %s1793_s3 = sand.u32 1, %s1259_s24  }
  0x6d   : > { %s1837_s19 = sld [smem:[#allocation18_spill]]  ;;  %s1615_s22 = sshll.u32 %s1793_s3, 3 }
  0x6e   : > { %s1838_s21 = sld [smem:[#allocation16_spill]]  ;;  %s370_s30 = scalar_lea.vmem [#allocation10], %s1615_s22 }
  0x6f   : > { %s1839_s29 = sld [smem:[#allocation29_spill]] }
  0x70   : > { %s1840_s12 = sld [smem:[#allocation30_spill]] }
  0x71   : > { %s1841_s26 = sld [smem:[#allocation31_spill]] }
  0x72   : > { %p374_p7 = scmp.lt.s32.totalorder %s1836_s9, 1  ;;  %p388_p1 = scmp.eq.s32.totalorder %s1836_s9, 0 }
  0x73   : > { %s855_s16 = sshll.u32 %s1837_s19, 1 }
  0x74   : > { %p381_p8 = scmp.lt.s32.totalorder %s855_s16, 3  ;;  %p389_p0 = scmp.eq.s32.totalorder %s1838_s21, 0 }
  0x75   : > { %s1619_s6 = scalar_select %p374_p7, %s1836_s9, 1 }
  0x76   : > { %s1886_s16 = smov (!%p381_p8, %s855_s16), 3  ;;  %p390_p2 = pnand %p389_p0, %p388_p1 }
  0x77   : > { %s376_s4 = scalar_lea.vmem %s1839_s29, %s1619_s6  ;;  %s379_s1 = scalar_lea.vmem %s1840_s12, %s1619_s6 }
  0x78   : > { %s856_s11 = sshll.u32 %s1886_s16, 3  ;;  %393 = sbr.rel (%p390_p2) target bundleno = 127 (0x7f), region = 52 }
  0x79   : > { %s1633_s19 = scalar_lea.vmem %s1841_s26, %s856_s11 }
  0x7d   : > { %v1324_v0 = vmov 0.0  }
  0x7e   : > { %394 = vst [vmem:[#allocation3 + $0x8] sm:$0xff] %v1324_v0  ;;  %395 = vst [vmem:[#allocation3] sm:$0xff] %v1324_v0 }
  0x7f PF: > { %s1842_s14 = sld [smem:[#allocation16_spill]] }
  0x85   : > { %p857_p13 = scmp.ne.s32.totalorder %s1842_s14, 0 }
  0x87   : > { %398 = sbr.rel (%p857_p13) target bundleno = 142 (0x8e), region = 56 }
  0x8c   : > { %v1325_v1 = vmov 0.0  }
  0x8d   : > { %399 = vst [vmem:[#allocation2] sm:$0xff] %v1325_v1  ;;  %400 = vst [vmem:[#allocation2 + $0x8] sm:$0xff] %v1325_v1 }
  0x8e PF: > { %v1076_v2 = vld [vmem:[%s1605_s15 + $0x78] sm:$0xff]   ;;  %v1078_v4 = vld [vmem:[%s1605_s15 + $0x70] sm:$0xff]   ;;  %v1080_v6 = vld [vmem:[%s1605_s15 + $0x68] sm:$0xff]   ;;  %s1843_s10 = scalar_lea.vmem [#allocation5], %s1597_s0  ;;  %s1844_s11 = sld [smem:[#allocation16_spill]] }
  0x8f   : > { %v1077_v3 = vld [vmem:[%s1605_s15 + $0x38] sm:$0xff]   ;;  %897 = vmatprep.subr.bf16.mxu0 %v1076_v2  ;;  %v1079_v5 = vld [vmem:[%s1605_s15 + $0x30] sm:$0xff]   ;;  %v1081_v7 = vld [vmem:[%s1605_s15 + $0x28] sm:$0xff]   ;;  %s1845_s26 = smov %s1843_s10 }
  0x90   : > { %898 = vmatpush3.bf16.msra.mxu0 %v1077_v3  ;;  %v1082_v8 = vld [vmem:[%s1605_s15 + $0x60] sm:$0xff]   ;;  %v1084_v10 = vld [vmem:[%s1605_s15 + $0x58] sm:$0xff]   ;;  %v1086_v12 = vld [vmem:[%s1605_s15 + $0x50] sm:$0xff]  }
  0x91   : > { %899 = vmatprep.subr.bf16.mxu0 %v1078_v4  ;;  %v1083_v9 = vld [vmem:[%s1605_s15 + $0x20] sm:$0xff]   ;;  %v1085_v11 = vld [vmem:[%s1605_s15 + $0x18] sm:$0xff]   ;;  %v1087_v14 = vld [vmem:[%s1605_s15 + $0x10] sm:$0xff]  }
  0x92   : > { %v1094_v13 = vld [vmem:[%s1843_s10 + $0x4] ss:$8 sps:$4 sm:$0xff]   ;;  %v1092_v19 = vld [vmem:[%s1845_s26] ss:$8 sps:$4 sm:$0xff]  }
  0x93   : > { %575 = vmatprep.mubr.bf16.mxu0 %v1094_v13  ;;  %v1088_v15 = vld [vmem:[%s1605_s15 + $0x48] sm:$0xff]   ;;  %v1090_v17 = vld [vmem:[%s1605_s15 + $0x40] sm:$0xff]  }
  0x94   : > { %900 = vmatpush3.bf16.msra.mxu0 %v1079_v5  ;;  %v1089_v16 = vld [vmem:[%s1605_s15 + $0x8] sm:$0xff]   ;;  %v1091_v18 = vld [vmem:[%s1605_s15] sm:$0xff]   ;;  %p588_p6 = scmp.eq.s32.totalorder %s1844_s11, 1  ;;  %p876_p10 = scmp.ne.s32.totalorder %s1844_s11, 1 }
  0x95   : > { %901 = vmatprep.subr.bf16.mxu0 %v1080_v6  ;;  %v401_v21 = vld [vmem:[#allocation2] sm:$0xff]  ;;  %v402_v26 = vld [vmem:[#allocation2 + $0x8] sm:$0xff] }
  0x98   : > { %902 = vmatpush3.bf16.msra.mxu0 %v1081_v7 }
  0x99   : > { %903 = vmatprep.subr.bf16.mxu0 %v1082_v8 }
  0x9c   : > { %904 = vmatpush3.bf16.msra.mxu0 %v1083_v9 }
  0x9d   : > { %905 = vmatprep.subr.bf16.mxu0 %v1084_v10 }
  0xa0   : > { %906 = vmatpush3.bf16.msra.mxu0 %v1085_v11 }
  0xa1   : > { %907 = vmatprep.subr.bf16.mxu0 %v1086_v12 }
  0xa4   : > { %908 = vmatpush3.bf16.msra.mxu0 %v1087_v14 }
  0xa5   : > { %909 = vmatprep.subr.bf16.mxu0 %v1088_v15 }
  0xa8   : > { %910 = vmatpush3.bf16.msra.mxu0 %v1089_v16 }
  0xa9   : > { %911 = vmatprep.subr.bf16.mxu0 %v1090_v17 }
  0xac   : > { %912 = vmatpush3.bf16.msra.mxu0 %v1091_v18 }
  0xaf   : > { %576 = vmatmul.mubr.bf16.vlgmr.msra.gmra.mxu0 %v1092_v19 }
 0x16f   : > { %v913_v20 = vpop.f32.mrf.mxu0 }
 0x171   : > { %v914_v22 = vpop.f32.mrf.mxu0 }
 0x172   : > { %v915_v23 = vadd.f32 %v914_v22, %v913_v20 }
 0x173   : > { %v916_v24 = vpop.f32.mrf.mxu0 }
 0x174   : > { %v584_v25 = vadd.f32 %v915_v23, %v401_v21 }
 0x175   : > { %v917_v27 = vpop.f32.mrf.mxu0 }
 0x176   : > { %586 = vst [vmem:[#allocation2] sm:$0xff] %v584_v25  ;;  %v918_v28 = vadd.f32 %v917_v27, %v916_v24  ;;  %591 = sbr.rel (%p876_p10) target bundleno = 397 (0x18d), region = 60 }
 0x178   : > { %v585_v29 = vadd.f32 %v918_v28, %v402_v26 }
 0x17a   : > { %587 = vst [vmem:[#allocation2 + $0x8] sm:$0xff] %v585_v29 }
 0x17b   : > { %v877_v32 = vld [vmem:[%s376_s4] ss:$0 sm:$0xff]  ;;  %v626_v40 = vld [vmem:[#allocation3 + $0x8] sm:$0xff]  ;;  %v627_v41 = vld [vmem:[#allocation3] sm:$0xff] }
 0x17c   : > { %v880_v37 = vld [vmem:[%s379_s1] ss:$0 sm:$0xff] }
 0x17d   : > { %v592_v30 = vld [vmem:[#allocation2] sm:$0xff] }
 0x17e   : > { %v601_v33 = vadd.f32 %v877_v32, %v592_v30 }
 0x180   : > { %v603_v35 = vmul.f32 0.2, %v601_v33 }
 0x181   : > { %v593_v31 = vld [vmem:[#allocation2 + $0x8] sm:$0xff] }
 0x182   : > { %v602_v34 = vadd.f32 %v877_v32, %v593_v31  ;;  %v605_v38 = vmax.f32 %v601_v33, %v603_v35 }
 0x184   : > { %v604_v36 = vmul.f32 0.2, %v602_v34  ;;  %v624_v43 = vmul.f32 %v880_v37, %v605_v38 }
 0x186   : > { %v606_v39 = vmax.f32 %v602_v34, %v604_v36  ;;  %v628_v45 = vadd.f32 %v626_v40, %v624_v43 }
 0x188   : > { %v895_v42 = vpack.c.bf16 %v606_v39, %v605_v38  ;;  %v625_v44 = vmul.f32 %v880_v37, %v606_v39  ;;  %630 = vst [vmem:[#allocation3 + $0x8] sm:$0xff] %v628_v45 }
 0x18a   : > { %896 = vst [vmem:[%s370_s30] sm:$0xff] %v895_v42   ;;  %v629_v46 = vadd.f32 %v627_v41, %v625_v44 }
 0x18c   : > { %631 = vst [vmem:[#allocation3] sm:$0xff] %v629_v46 }
 0x18d PF: > { %s1848_s16 = sld [smem:[#allocation17_spill]] }
 0x193   : > { %p632_p3 = scmp.eq.s32.totalorder %s1848_s16, 1 }
 0x195   : > { %p633_p5 = pnand %p632_p3, %p588_p6 }
 0x196   : > { %s643_s1 = sld [smem:[#allocation4]] (!%p633_p5) }
 0x197   : > { %636 = sbr.rel (%p633_p5) target bundleno = 558 (0x22e), region = 64 }
 0x19c   : > { %v637_v47 = vld [vmem:[#allocation3 + $0x8] sm:$0xff]  ;;  %v638_v48 = vld [vmem:[#allocation3] sm:$0xff]  ;;  %v644_v49 = vstv %s643_s1  ;;  %vm647_vm0 = vcmask 7168  }
 0x19d   : > { %639 = vadd.xlane.f32.xlu0 %v637_v47 }
 0x1a1   : > { %641 = vadd.xlane.f32.xlu0 %v638_v48 }
 0x226   : > { %v640_v50 = vpop.xlane.xlu0 %639 }
 0x227   : > { %v645_v51 = vadd.f32 %v644_v49, %v640_v50 }
 0x229   : > { %648 = vst.msk [vmem:[%s1633_s19] sm:$0xff] %vm647_vm0, %v645_v51 }
 0x22a   : > { %v642_v52 = vpop.xlane.xlu0 %641 }
 0x22b   : > { %v646_v53 = vadd.f32 %v644_v49, %v642_v52 }
 0x22d   : > { %649 = vst.msk [vmem:[%s1633_s19 + $0x8] sm:$0xff] %vm647_vm0, %v646_v53 }
 0x22e PF: > { %s1850_s6 = sld [smem:[#allocation18_spill]]  ;;  %s675_s18 = sshll.u32 %s370_s30, 4  ;;  %s1681_s18 = int_to_ptr.vmem [resolvable:$true] %s675_s18 }
 0x22f   : > { %s1851_s29 = sld [smem:[#allocation17_spill]]  ;;  %s1854_s12 = sand.u32 1, %s1259_s24  }
 0x230   : > { %s1852_s26 = sld [smem:[#allocation32_spill]]  ;;  %s1690_s15 = scalar_lea.sflag [#allocation7], %s1854_s12 }
 0x231   : > { %s1151_s9 = scalar_lea.vmem %s1681_s18, 128  ;;  %p1855_p11 = scmp.ne.s32.totalorder %s1826_s5, 0 }
 0x232   : > { %p1152_p4 = scmp.ne.s32.totalorder %s1681_s18, %s1151_s9  ;;  %s1326_s30 = smov [#allocation10]  }
 0x233   : > { %s1155_s22 = sshll.u32 %s1326_s30, 4  ;;  %s1156_s22 = int_to_ptr.vmem [resolvable:$false] %s1155_s22 }
 0x234   : > { %s891_s4 = sshll.u32 %s1850_s6, 2  ;;  %p1153_p12 = pnand %p1152_p4, %p1855_p11 }
 0x235   : > { %s672_s20 = sadd.s32 %s1851_s29, %s891_s4  ;;  %s1157_s21 = scalar_lea.vmem %s1156_s22, 256 }
 0x236   : > { %s884_s14 = sshll.u32 %s672_s20, 6  ;;  %s1853_s0 = smov %s1852_s26 }
 0x237   : > { %s1686_s19 = scalar_lea.hbm %s1852_s26, %s884_s14  ;;  %p1154_p9 = pneg %p1153_p12 }
 0x238   : > { %p1158_p7 = scmp.lt.s32.totalorder %s1681_s18, %s1156_s22  ;;  %p1159_p8 = scmp.lt.s32.totalorder %s1157_s21, %s1151_s9 }
 0x23a   : > { %p1160_p1 = por %p1159_p8, %p1158_p7 }
 0x23c   : > { %p1161_p0 = pnand %p1160_p1, %p1154_p9 }
 0x23e   : > { %1164 = shalt.err (!%p1161_p0)
}
 0x23f   : > { %s1165_s3 = scalar_lea.hbm %s1686_s19, 128  ;;  %s1169_s1 = scalar_lea.hbm %s1853_s0, 512 }
 0x240   : > { %p1166_p2 = scmp.ne.s32.totalorder %s1686_s19, %s1165_s3  ;;  %p1170_p10 = scmp.lt.s32.totalorder %s1686_s19, %s1853_s0 }
 0x241   : > { %p1171_p3 = scmp.lt.s32.totalorder %s1169_s1, %s1165_s3 }
 0x242   : > { %p1167_p13 = pnand %p1166_p2, %p1855_p11 }
 0x243   : > { %p1172_p5 = por %p1171_p3, %p1170_p10 }
 0x244   : > { %p1168_p6 = pneg %p1167_p13 }
 0x246   : > { %p1173_p4 = pnand %p1172_p5, %p1168_p6 }
 0x248   : > { %1176 = shalt.err (!%p1173_p4)
}
 0x249   : > { %s1327_s4 = smov 64   ;;  %s1328_s20 = smov 128  }
 0x24a   : > { %s1329_s14 = smov 4  }
 0x24b   : > { %923 = dma.vmem_to_hbm [thread:$0]  (%p1855_p11), %s1681_s18, 128, %s1686_s19, %s1690_s15, %s1327_s4, %s1328_s20, %s1329_s14  }
 0x24c PF: > { %p937_p12 = scmp.ge.s32.totalorder %s1315_s13, 2  ;;  %s698_s10 = sand.u32 1, %s1255_s23  }
 0x24d   : > { %p1856_p9 = scmp.ne.s32.totalorder %s1829_s17, 0  ;;  %s699_s11 = scalar_lea.sflag [#allocation7], %s698_s10 }
 0x24f   : > { %p933_p7 = pnand %p937_p12, %p1856_p9 }
 0x251   : > { %p934_p8 = pneg %p933_p7 }
 0x253   : > { %1250 = dma.done.wait (%p934_p8), %s699_s11, 128  }
 0x254   : > { %1252 = vsyncadd (%p934_p8), %s699_s11, 4294967168  ;;  %s27_s13 = sadd.s32 1, %s1315_s13   ;;  %s1858_s29 = sld [smem:[#allocation14_spill]] }
 0x255   : > { %p1718_p1 = scmp.ge.s32.totalorder %s27_s13, 10   ;;  %s1859_s4 = sld [smem:[#allocation15_spill]] }
 0x256   : > { %s1860_s30 = sld [smem:[#allocation26_spill]]  ;;  %s1867_s23 = smov %s1259_s24 }
 0x257   : > { %s1861_s5 = sld [smem:[#allocation19_spill]]  ;;  %s1869_s24 = smov %s1263_s25 }
 0x258   : > { %s1862_s8 = sld [smem:[#allocation20_spill]]  ;;  %s1870_s25 = smov %s1569_s7 }
 0x259   : > { %s1863_s9 = sld [smem:[#allocation21_spill]]  ;;  %s1871_s26 = smov %s1271_s27 }
 0x25a   : > { %s1864_s10 = sld [smem:[#allocation22_spill]]  ;;  %s1872_s27 = smov %s1275_s28 }
 0x25b   : > { %s1865_s11 = sld [smem:[#allocation24_spill]]  ;;  %s1873_s28 = smov %s1550_s2 }
 0x25c   : > { %s1866_s12 = sld [smem:[#allocation25_spill]]  ;;  %26 = sbr.rel (!%p1718_p1) target bundleno = 21 (0x15), region = 132 }
 0x25d   : > { %s1874_s7 = smov %s1861_s5 }
 0x261   :  { %704 = vsyncpa [#allocation6], 1 }
 0x262   :  { %706 = vsyncpa [#allocation6 + $0x1], 1 }
 0x263   :  { %707 = vsyncpa [#allocation9], 1 }
 0x264   :  { %709 = vsyncpa [#allocation9 + $0x1], 1 }
 0x265   :  { %710 = vsyncpa [#allocation7], 1 }
 0x266   :  { %712 = vsyncpa [#allocation7 + $0x1], 1 }

</bundles_post_ra>
